<compile_context>
chip_gen: v7x
topology: tpu7x:2x2x1
jax: 0.10.0
libtpu: 0.0.40
codegen_flags: <defaults>
</compile_context>

<pallas_src>
import functools

import jax
import jax.numpy as jnp
from jax.experimental import pallas as pl
from jax.experimental.pallas import tpu as pltpu


# ----------------------------------------------------------------------------
# Fused 3x3 conv + folded-BN + ReLU Pallas kernel
# ----------------------------------------------------------------------------
def _conv3x3_bn_relu_kernel(x_ref, w_ref, b_ref, o_ref, *, th, w_out, c_in, c_out):
    """One fused row-tile of (3x3 conv + BN-folded bias + ReLU).

    x_ref: (1, H+2, W+2, Cin)  spatially padded input image (VMEM-resident)
    w_ref: (9, Cin, Cout)      BN-folded conv weights, taps flattened (dy*3+dx)
    b_ref: (1, Cout)           BN-folded bias
    o_ref: (1, TH, W, Cout)    output row tile
    """
    r = pl.program_id(1)
    row0 = pl.multiple_of(r * th, th)

    acc = jnp.zeros((th * w_out, c_out), jnp.float32)
    for tap in range(9):  # static unroll over the 3x3 taps
        dy, dx = tap // 3, tap % 3
        patch = x_ref[0, pl.ds(row0 + dy, th), pl.ds(dx, w_out), :]  # (TH, W, Cin)
        acc = acc + jnp.dot(
            patch.reshape(th * w_out, c_in),
            w_ref[tap],
            preferred_element_type=jnp.float32,
        )
    y = jnp.maximum(acc + b_ref[...], 0.0)  # folded-BN bias + ReLU
    o_ref[0] = y.reshape(th, w_out, c_out).astype(o_ref.dtype)


def conv3x3_bn_relu_pallas(x_nhwc, w9, bias, *, tile_rows):
    """Fused Conv2d(3x3, pad=1) + BatchNorm(eval) + ReLU.  x_nhwc: (N,H,W,Cin)."""
    N, H, W, Cin = x_nhwc.shape
    Cout = w9.shape[-1]
    assert H % tile_rows == 0, "tile_rows must divide H"

    # Single host-side pass: spatial zero-padding (padding=1).
    xp = jnp.pad(x_nhwc, ((0, 0), (1, 1), (1, 1), (0, 0)))

    kernel = functools.partial(
        _conv3x3_bn_relu_kernel, th=tile_rows, w_out=W, c_in=Cin, c_out=Cout
    )
    return pl.pallas_call(
        kernel,
        out_shape=jax.ShapeDtypeStruct((N, H, W, Cout), x_nhwc.dtype),
        grid=(N, H // tile_rows),
        in_specs=[
            # Full padded image per batch element; constant block index across
            # row tiles -> stays resident in VMEM (no refetch).
            pl.BlockSpec((1, H + 2, W + 2, Cin), lambda n, r: (n, 0, 0, 0)),
            # Folded weights / bias: constant block -> VMEM-resident.
            pl.BlockSpec((9, Cin, Cout), lambda n, r: (0, 0, 0)),
            pl.BlockSpec((1, Cout), lambda n, r: (0, 0)),
        ],
        out_specs=pl.BlockSpec(
            (1, tile_rows, W, Cout), lambda n, r: (n, r, 0, 0)
        ),
        compiler_params=pltpu.CompilerParams(
            dimension_semantics=("parallel", "parallel"),
            vmem_limit_bytes=32 * 1024 * 1024,
        ),
    )(xp, w9, bias.reshape(1, Cout))


# ----------------------------------------------------------------------------
# BN folding + module forward
# ----------------------------------------------------------------------------
def fold_conv_bn(w_oihw, b_conv, gamma, beta, mean, var, eps=1e-5):
    """Fold eval-mode BatchNorm into the conv weights/bias.

    Returns w9 of shape (9, Cin, Cout) (taps flattened, HWIO-style) and bias (Cout,).
    """
    inv = gamma / jnp.sqrt(var + eps)                       # (Cout,)
    w_hwio = jnp.transpose(w_oihw, (2, 3, 1, 0))            # (3,3,Cin,Cout)
    kh, kw, cin, cout = w_hwio.shape
    w9 = (w_hwio * inv).reshape(kh * kw, cin, cout)
    b_eff = (b_conv - mean) * inv + beta
    return w9.astype(jnp.float32), b_eff.astype(jnp.float32)


def double_conv_forward(x_nchw, params, *, tile_rows=8):
    """Mirrors DoubleConv.forward (BN in eval mode).  x: (N, Cin, H, W) -> (N, Cout, H, W)."""
    x = jnp.transpose(x_nchw, (0, 2, 3, 1))  # NCHW -> NHWC (channels on lanes)

    w9_1, b1 = fold_conv_bn(
        params["conv1_w"], params["conv1_b"], params["bn1_gamma"],
        params["bn1_beta"], params["bn1_mean"], params["bn1_var"])
    w9_2, b2 = fold_conv_bn(
        params["conv2_w"], params["conv2_b"], params["bn2_gamma"],
        params["bn2_beta"], params["bn2_mean"], params["bn2_var"])

    y = conv3x3_bn_relu_pallas(x, w9_1, b1, tile_rows=tile_rows)
    y = conv3x3_bn_relu_pallas(y, w9_2, b2, tile_rows=tile_rows)

    return jnp.transpose(y, (0, 3, 1, 2))  # NHWC -> NCHW


# ----------------------------------------------------------------------------
# Deterministic parameter init (shapes from DoubleConv.__init__)
# ----------------------------------------------------------------------------
def init_params(key, c_in, c_out):
    keys = jax.random.split(key, 12)

    def conv_w(k, co, ci):
        bound = (1.0 / (ci * 9)) ** 0.5
        return jax.random.uniform(k, (co, ci, 3, 3), jnp.float32, -bound, bound)

    def conv_b(k, co, ci):
        bound = (1.0 / (ci * 9)) ** 0.5
        return jax.random.uniform(k, (co,), jnp.float32, -bound, bound)

    return {
        "conv1_w": conv_w(keys[0], c_out, c_in),
        "conv1_b": conv_b(keys[1], c_out, c_in),
        "bn1_gamma": jax.random.uniform(keys[2], (c_out,), jnp.float32, 0.5, 1.5),
        "bn1_beta": 0.1 * jax.random.normal(keys[3], (c_out,), jnp.float32),
        "bn1_mean": 0.1 * jax.random.normal(keys[4], (c_out,), jnp.float32),
        "bn1_var": jax.random.uniform(keys[5], (c_out,), jnp.float32, 0.5, 1.5),
        "conv2_w": conv_w(keys[6], c_out, c_out),
        "conv2_b": conv_b(keys[7], c_out, c_out),
        "bn2_gamma": jax.random.uniform(keys[8], (c_out,), jnp.float32, 0.5, 1.5),
        "bn2_beta": 0.1 * jax.random.normal(keys[9], (c_out,), jnp.float32),
        "bn2_mean": 0.1 * jax.random.normal(keys[10], (c_out,), jnp.float32),
        "bn2_var": jax.random.uniform(keys[11], (c_out,), jnp.float32, 0.5, 1.5),
    }


# Pure-JAX reference (unfolded BN) for a correctness check
def _reference(x_nchw, params, eps=1e-5):
    def stage(x, w, b, gamma, beta, mean, var):
        y = jax.lax.conv_general_dilated(
            x, w, window_strides=(1, 1), padding=((1, 1), (1, 1)),
            dimension_numbers=("NCHW", "OIHW", "NCHW"))
        y = y + b[None, :, None, None]
        inv = gamma / jnp.sqrt(var + eps)
        y = (y - mean[None, :, None, None]) * inv[None, :, None, None] \
            + beta[None, :, None, None]
        return jnp.maximum(y, 0.0)

    y = stage(x_nchw, params["conv1_w"], params["conv1_b"], params["bn1_gamma"],
              params["bn1_beta"], params["bn1_mean"], params["bn1_var"])
    y = stage(y, params["conv2_w"], params["conv2_b"], params["bn2_gamma"],
              params["bn2_beta"], params["bn2_mean"], params["bn2_var"])
    return y


if __name__ == "__main__":
    # Small shapes: batch=2, in_channels=4, out_channels=8, spatial 16x16
    N, C_IN, C_OUT, H, W = 2, 4, 8, 16, 16
    root = jax.random.PRNGKey(0)
    kx, kp = jax.random.split(root)

    x = jax.random.normal(kx, (N, C_IN, H, W), jnp.float32)
    params = init_params(kp, C_IN, C_OUT)

    out = double_conv_forward(x, params, tile_rows=8)
    out = jax.block_until_ready(out)

    ref = _reference(x, params)
    assert out.shape == (N, C_OUT, H, W)
    max_err = float(jnp.max(jnp.abs(out - ref)))
    assert jnp.allclose(out, ref, rtol=1e-4, atol=1e-4), f"max abs err {max_err}"

    print("KERNEL_OK")
</pallas_src>

<mosaic_0001>
module attributes {stable_mosaic.version = 11 : i64} {
  func.func @_conv3x3_bn_relu_kernel(%arg0: i32, %arg1: i32, %arg2: memref<1x18x18x4xf32, #tpu.memory_space<vmem>>, %arg3: memref<9x4x8xf32, #tpu.memory_space<vmem>>, %arg4: memref<1x8xf32, #tpu.memory_space<vmem>>, %arg5: memref<1x8x16x8xf32, #tpu.memory_space<vmem>>) attributes {dimension_semantics = [#tpu.dimension_semantics<parallel>, #tpu.dimension_semantics<parallel>], iteration_bounds = array<i64: 2, 2>, scalar_prefetch = 0 : i64, scratch_operands = 0 : i64, tpu.core_type = #tpu.core_type<tc>, window_params = [{transform_indices = @transform_0, window_bounds = array<i64: 1, 18, 18, 4>}, {pipeline_mode = #tpu.pipeline_mode<synchronous>, transform_indices = @transform_1, window_bounds = array<i64: 9, 4, 8>}, {pipeline_mode = #tpu.pipeline_mode<synchronous>, transform_indices = @transform_2, window_bounds = array<i64: 1, 8>}, {transform_indices = @transform_3, window_bounds = array<i64: 1, 8, 16, 8>}]} {
    %c8_i32 = arith.constant 8 : i32
    %0 = arith.muli %arg1, %c8_i32 : i32
    %1 = tpu.assume_multiple %0, 8 : i32
    %cst = arith.constant 0.000000e+00 : f32
    %2 = vector.broadcast %cst : f32 to vector<128x8xf32>
    %c0_i32 = arith.constant 0 : i32
    %3 = arith.addi %1, %c0_i32 : i32
    %c0 = arith.constant 0 : index
    %4 = arith.index_cast %3 : i32 to index
    %c0_0 = arith.constant 0 : index
    %c0_1 = arith.constant 0 : index
    %5 = vector.load %arg2[%c0, %4, %c0_0, %c0_1] : memref<1x18x18x4xf32, #tpu.memory_space<vmem>>, vector<1x8x16x4xf32>
    %6 = vector.shape_cast %5 : vector<1x8x16x4xf32> to vector<8x16x4xf32>
    %7 = vector.shape_cast %6 : vector<8x16x4xf32> to vector<128x4xf32>
    %c0_2 = arith.constant 0 : index
    %c0_3 = arith.constant 0 : index
    %c0_4 = arith.constant 0 : index
    %8 = vector.load %arg3[%c0_2, %c0_3, %c0_4] : memref<9x4x8xf32, #tpu.memory_space<vmem>>, vector<1x4x8xf32>
    %9 = vector.shape_cast %8 : vector<1x4x8xf32> to vector<4x8xf32>
    %cst_5 = arith.constant dense<0.000000e+00> : vector<128x8xf32>
    %10 = tpu.matmul %7, %9, %cst_5 {dimension_numbers = #tpu.dot_dimension_numbers<[1], [0], [0], [1], [0, 0, 1, 1], [], []>} : vector<128x4xf32>, vector<4x8xf32>, vector<128x8xf32> -> vector<128x8xf32>
    %11 = arith.addf %2, %10 : vector<128x8xf32>
    %c0_i32_6 = arith.constant 0 : i32
    %12 = arith.addi %1, %c0_i32_6 : i32
    %c0_7 = arith.constant 0 : index
    %13 = arith.index_cast %12 : i32 to index
    %c1 = arith.constant 1 : index
    %c0_8 = arith.constant 0 : index
    %14 = vector.load %arg2[%c0_7, %13, %c1, %c0_8] : memref<1x18x18x4xf32, #tpu.memory_space<vmem>>, vector<1x8x16x4xf32>
    %15 = vector.shape_cast %14 : vector<1x8x16x4xf32> to vector<8x16x4xf32>
    %16 = vector.shape_cast %15 : vector<8x16x4xf32> to vector<128x4xf32>
    %c1_9 = arith.constant 1 : index
    %c0_10 = arith.constant 0 : index
    %c0_11 = arith.constant 0 : index
    %17 = vector.load %arg3[%c1_9, %c0_10, %c0_11] : memref<9x4x8xf32, #tpu.memory_space<vmem>>, vector<1x4x8xf32>
    %18 = vector.shape_cast %17 : vector<1x4x8xf32> to vector<4x8xf32>
    %cst_12 = arith.constant dense<0.000000e+00> : vector<128x8xf32>
    %19 = tpu.matmul %16, %18, %cst_12 {dimension_numbers = #tpu.dot_dimension_numbers<[1], [0], [0], [1], [0, 0, 1, 1], [], []>} : vector<128x4xf32>, vector<4x8xf32>, vector<128x8xf32> -> vector<128x8xf32>
    %20 = arith.addf %11, %19 : vector<128x8xf32>
    %c0_i32_13 = arith.constant 0 : i32
    %21 = arith.addi %1, %c0_i32_13 : i32
    %c0_14 = arith.constant 0 : index
    %22 = arith.index_cast %21 : i32 to index
    %c2 = arith.constant 2 : index
    %c0_15 = arith.constant 0 : index
    %23 = vector.load %arg2[%c0_14, %22, %c2, %c0_15] : memref<1x18x18x4xf32, #tpu.memory_space<vmem>>, vector<1x8x16x4xf32>
    %24 = vector.shape_cast %23 : vector<1x8x16x4xf32> to vector<8x16x4xf32>
    %25 = vector.shape_cast %24 : vector<8x16x4xf32> to vector<128x4xf32>
    %c2_16 = arith.constant 2 : index
    %c0_17 = arith.constant 0 : index
    %c0_18 = arith.constant 0 : index
    %26 = vector.load %arg3[%c2_16, %c0_17, %c0_18] : memref<9x4x8xf32, #tpu.memory_space<vmem>>, vector<1x4x8xf32>
    %27 = vector.shape_cast %26 : vector<1x4x8xf32> to vector<4x8xf32>
    %cst_19 = arith.constant dense<0.000000e+00> : vector<128x8xf32>
    %28 = tpu.matmul %25, %27, %cst_19 {dimension_numbers = #tpu.dot_dimension_numbers<[1], [0], [0], [1], [0, 0, 1, 1], [], []>} : vector<128x4xf32>, vector<4x8xf32>, vector<128x8xf32> -> vector<128x8xf32>
    %29 = arith.addf %20, %28 : vector<128x8xf32>
    %c1_i32 = arith.constant 1 : i32
    %30 = arith.addi %1, %c1_i32 : i32
    %c0_20 = arith.constant 0 : index
    %31 = arith.index_cast %30 : i32 to index
    %c0_21 = arith.constant 0 : index
    %c0_22 = arith.constant 0 : index
    %32 = vector.load %arg2[%c0_20, %31, %c0_21, %c0_22] : memref<1x18x18x4xf32, #tpu.memory_space<vmem>>, vector<1x8x16x4xf32>
    %33 = vector.shape_cast %32 : vector<1x8x16x4xf32> to vector<8x16x4xf32>
    %34 = vector.shape_cast %33 : vector<8x16x4xf32> to vector<128x4xf32>
    %c3 = arith.constant 3 : index
    %c0_23 = arith.constant 0 : index
    %c0_24 = arith.constant 0 : index
    %35 = vector.load %arg3[%c3, %c0_23, %c0_24] : memref<9x4x8xf32, #tpu.memory_space<vmem>>, vector<1x4x8xf32>
    %36 = vector.shape_cast %35 : vector<1x4x8xf32> to vector<4x8xf32>
    %cst_25 = arith.constant dense<0.000000e+00> : vector<128x8xf32>
    %37 = tpu.matmul %34, %36, %cst_25 {dimension_numbers = #tpu.dot_dimension_numbers<[1], [0], [0], [1], [0, 0, 1, 1], [], []>} : vector<128x4xf32>, vector<4x8xf32>, vector<128x8xf32> -> vector<128x8xf32>
    %38 = arith.addf %29, %37 : vector<128x8xf32>
    %c1_i32_26 = arith.constant 1 : i32
    %39 = arith.addi %1, %c1_i32_26 : i32
    %c0_27 = arith.constant 0 : index
    %40 = arith.index_cast %39 : i32 to index
    %c1_28 = arith.constant 1 : index
    %c0_29 = arith.constant 0 : index
    %41 = vector.load %arg2[%c0_27, %40, %c1_28, %c0_29] : memref<1x18x18x4xf32, #tpu.memory_space<vmem>>, vector<1x8x16x4xf32>
    %42 = vector.shape_cast %41 : vector<1x8x16x4xf32> to vector<8x16x4xf32>
    %43 = vector.shape_cast %42 : vector<8x16x4xf32> to vector<128x4xf32>
    %c4 = arith.constant 4 : index
    %c0_30 = arith.constant 0 : index
    %c0_31 = arith.constant 0 : index
    %44 = vector.load %arg3[%c4, %c0_30, %c0_31] : memref<9x4x8xf32, #tpu.memory_space<vmem>>, vector<1x4x8xf32>
    %45 = vector.shape_cast %44 : vector<1x4x8xf32> to vector<4x8xf32>
    %cst_32 = arith.constant dense<0.000000e+00> : vector<128x8xf32>
    %46 = tpu.matmul %43, %45, %cst_32 {dimension_numbers = #tpu.dot_dimension_numbers<[1], [0], [0], [1], [0, 0, 1, 1], [], []>} : vector<128x4xf32>, vector<4x8xf32>, vector<128x8xf32> -> vector<128x8xf32>
    %47 = arith.addf %38, %46 : vector<128x8xf32>
    %c1_i32_33 = arith.constant 1 : i32
    %48 = arith.addi %1, %c1_i32_33 : i32
    %c0_34 = arith.constant 0 : index
    %49 = arith.index_cast %48 : i32 to index
    %c2_35 = arith.constant 2 : index
    %c0_36 = arith.constant 0 : index
    %50 = vector.load %arg2[%c0_34, %49, %c2_35, %c0_36] : memref<1x18x18x4xf32, #tpu.memory_space<vmem>>, vector<1x8x16x4xf32>
    %51 = vector.shape_cast %50 : vector<1x8x16x4xf32> to vector<8x16x4xf32>
    %52 = vector.shape_cast %51 : vector<8x16x4xf32> to vector<128x4xf32>
    %c5 = arith.constant 5 : index
    %c0_37 = arith.constant 0 : index
    %c0_38 = arith.constant 0 : index
    %53 = vector.load %arg3[%c5, %c0_37, %c0_38] : memref<9x4x8xf32, #tpu.memory_space<vmem>>, vector<1x4x8xf32>
    %54 = vector.shape_cast %53 : vector<1x4x8xf32> to vector<4x8xf32>
    %cst_39 = arith.constant dense<0.000000e+00> : vector<128x8xf32>
    %55 = tpu.matmul %52, %54, %cst_39 {dimension_numbers = #tpu.dot_dimension_numbers<[1], [0], [0], [1], [0, 0, 1, 1], [], []>} : vector<128x4xf32>, vector<4x8xf32>, vector<128x8xf32> -> vector<128x8xf32>
    %56 = arith.addf %47, %55 : vector<128x8xf32>
    %c2_i32 = arith.constant 2 : i32
    %57 = arith.addi %1, %c2_i32 : i32
    %c0_40 = arith.constant 0 : index
    %58 = arith.index_cast %57 : i32 to index
    %c0_41 = arith.constant 0 : index
    %c0_42 = arith.constant 0 : index
    %59 = vector.load %arg2[%c0_40, %58, %c0_41, %c0_42] : memref<1x18x18x4xf32, #tpu.memory_space<vmem>>, vector<1x8x16x4xf32>
    %60 = vector.shape_cast %59 : vector<1x8x16x4xf32> to vector<8x16x4xf32>
    %61 = vector.shape_cast %60 : vector<8x16x4xf32> to vector<128x4xf32>
    %c6 = arith.constant 6 : index
    %c0_43 = arith.constant 0 : index
    %c0_44 = arith.constant 0 : index
    %62 = vector.load %arg3[%c6, %c0_43, %c0_44] : memref<9x4x8xf32, #tpu.memory_space<vmem>>, vector<1x4x8xf32>
    %63 = vector.shape_cast %62 : vector<1x4x8xf32> to vector<4x8xf32>
    %cst_45 = arith.constant dense<0.000000e+00> : vector<128x8xf32>
    %64 = tpu.matmul %61, %63, %cst_45 {dimension_numbers = #tpu.dot_dimension_numbers<[1], [0], [0], [1], [0, 0, 1, 1], [], []>} : vector<128x4xf32>, vector<4x8xf32>, vector<128x8xf32> -> vector<128x8xf32>
    %65 = arith.addf %56, %64 : vector<128x8xf32>
    %c2_i32_46 = arith.constant 2 : i32
    %66 = arith.addi %1, %c2_i32_46 : i32
    %c0_47 = arith.constant 0 : index
    %67 = arith.index_cast %66 : i32 to index
    %c1_48 = arith.constant 1 : index
    %c0_49 = arith.constant 0 : index
    %68 = vector.load %arg2[%c0_47, %67, %c1_48, %c0_49] : memref<1x18x18x4xf32, #tpu.memory_space<vmem>>, vector<1x8x16x4xf32>
    %69 = vector.shape_cast %68 : vector<1x8x16x4xf32> to vector<8x16x4xf32>
    %70 = vector.shape_cast %69 : vector<8x16x4xf32> to vector<128x4xf32>
    %c7 = arith.constant 7 : index
    %c0_50 = arith.constant 0 : index
    %c0_51 = arith.constant 0 : index
    %71 = vector.load %arg3[%c7, %c0_50, %c0_51] : memref<9x4x8xf32, #tpu.memory_space<vmem>>, vector<1x4x8xf32>
    %72 = vector.shape_cast %71 : vector<1x4x8xf32> to vector<4x8xf32>
    %cst_52 = arith.constant dense<0.000000e+00> : vector<128x8xf32>
    %73 = tpu.matmul %70, %72, %cst_52 {dimension_numbers = #tpu.dot_dimension_numbers<[1], [0], [0], [1], [0, 0, 1, 1], [], []>} : vector<128x4xf32>, vector<4x8xf32>, vector<128x8xf32> -> vector<128x8xf32>
    %74 = arith.addf %65, %73 : vector<128x8xf32>
    %c2_i32_53 = arith.constant 2 : i32
    %75 = arith.addi %1, %c2_i32_53 : i32
    %c0_54 = arith.constant 0 : index
    %76 = arith.index_cast %75 : i32 to index
    %c2_55 = arith.constant 2 : index
    %c0_56 = arith.constant 0 : index
    %77 = vector.load %arg2[%c0_54, %76, %c2_55, %c0_56] : memref<1x18x18x4xf32, #tpu.memory_space<vmem>>, vector<1x8x16x4xf32>
    %78 = vector.shape_cast %77 : vector<1x8x16x4xf32> to vector<8x16x4xf32>
    %79 = vector.shape_cast %78 : vector<8x16x4xf32> to vector<128x4xf32>
    %c8 = arith.constant 8 : index
    %c0_57 = arith.constant 0 : index
    %c0_58 = arith.constant 0 : index
    %80 = vector.load %arg3[%c8, %c0_57, %c0_58] : memref<9x4x8xf32, #tpu.memory_space<vmem>>, vector<1x4x8xf32>
    %81 = vector.shape_cast %80 : vector<1x4x8xf32> to vector<4x8xf32>
    %cst_59 = arith.constant dense<0.000000e+00> : vector<128x8xf32>
    %82 = tpu.matmul %79, %81, %cst_59 {dimension_numbers = #tpu.dot_dimension_numbers<[1], [0], [0], [1], [0, 0, 1, 1], [], []>} : vector<128x4xf32>, vector<4x8xf32>, vector<128x8xf32> -> vector<128x8xf32>
    %83 = arith.addf %74, %82 : vector<128x8xf32>
    %c0_60 = arith.constant 0 : index
    %c0_61 = arith.constant 0 : index
    %84 = vector.load %arg4[%c0_60, %c0_61] : memref<1x8xf32, #tpu.memory_space<vmem>>, vector<1x8xf32>
    %85 = vector.broadcast %84 : vector<1x8xf32> to vector<128x8xf32>
    %86 = arith.addf %83, %85 : vector<128x8xf32>
    %cst_62 = arith.constant 0.000000e+00 : f32
    %87 = vector.broadcast %cst_62 : f32 to vector<128x8xf32>
    %88 = arith.maximumf %86, %87 : vector<128x8xf32>
    %89 = vector.shape_cast %88 : vector<128x8xf32> to vector<8x16x8xf32>
    %c0_63 = arith.constant 0 : index
    %c0_64 = arith.constant 0 : index
    %c0_65 = arith.constant 0 : index
    %c0_66 = arith.constant 0 : index
    %90 = vector.load %arg5[%c0_63, %c0_64, %c0_65, %c0_66] : memref<1x8x16x8xf32, #tpu.memory_space<vmem>>, vector<1x8x16x8xf32>
    %91 = vector.shape_cast %90 : vector<1x8x16x8xf32> to vector<8x16x8xf32>
    %92 = vector.shape_cast %89 : vector<8x16x8xf32> to vector<1x8x16x8xf32>
    tpu.vector_store %arg5[%c0_63, %c0_64, %c0_65, %c0_66], %92 {strides = array<i32>} : memref<1x8x16x8xf32, #tpu.memory_space<vmem>>, vector<1x8x16x8xf32>,
    return
  }
  func.func @transform_0(%arg0: i32, %arg1: i32) -> (i32, i32, i32, i32) {
    %c0_i32 = arith.constant 0 : i32
    %c0_i32_0 = arith.constant 0 : i32
    %c0_i32_1 = arith.constant 0 : i32
    %c0_i32_2 = arith.constant 0 : i32
    return %arg0, %c0_i32, %c0_i32_0, %c0_i32_1 : i32, i32, i32, i32
  }
  func.func @transform_1(%arg0: i32, %arg1: i32) -> (i32, i32, i32) {
    %c0_i32 = arith.constant 0 : i32
    %c0_i32_0 = arith.constant 0 : i32
    %c0_i32_1 = arith.constant 0 : i32
    %c0_i32_2 = arith.constant 0 : i32
    return %c0_i32, %c0_i32_0, %c0_i32_1 : i32, i32, i32
  }
  func.func @transform_2(%arg0: i32, %arg1: i32) -> (i32, i32) {
    %c0_i32 = arith.constant 0 : i32
    %c0_i32_0 = arith.constant 0 : i32
    %c0_i32_1 = arith.constant 0 : i32
    return %c0_i32, %c0_i32_0 : i32, i32
  }
  func.func @transform_3(%arg0: i32, %arg1: i32) -> (i32, i32, i32, i32) {
    %c0_i32 = arith.constant 0 : i32
    %c0_i32_0 = arith.constant 0 : i32
    %c0_i32_1 = arith.constant 0 : i32
    return %arg0, %arg1, %c0_i32, %c0_i32_0 : i32, i32, i32, i32
  }
}

</mosaic_0001>

<bundles_post_ra>
// kernel: tpu_custom_call.1
= control target key start
LH: loop header
LB: loop body
LE: loop exit
PB: predicated region body
PF: predicated region fallthrough
CT: control target
= control target key end

     0   :  { %s3294_s12 = smov 0   ;;  %s3296_s13 = smov 0   ;;  %s3883_s0 = inlined_call_operand.vmem [shape: f32[2,18,18,4], index: 0, kind: input, shape index: {}]   ;;  %s3884_s1 = inlined_call_operand.vmem [shape: f32[9,4,8], index: 1, kind: input, shape index: {}]   ;;  %s3885_s2 = inlined_call_operand.vmem [shape: f32[1,8], index: 2, kind: input, shape index: {}]   ;;  %s3886_s3 = inlined_call_operand.vmem [shape: f32[2,16,16,8], index: 3, kind: output, shape index: {}]  }
   0x1   :  { %s3298_s14 = smov 0   ;;  %s3300_s15 = smov 0  }
   0x2   :  { %s3302_s16 = smov 0  }
   0x3 LB: > { %s22_s17 = sadd.s32 1, %s3264_s14  ;;  %s25_s18 = sadd.s32 1, %s3268_s15  ;;  %s3272_s16 = sphi %s3302_s16, %s13_s16   ;;  %s3268_s15 = sphi %s3300_s15, %s3890_s15   ;;  %s3264_s14 = sphi %s3298_s14, %s3889_s14   ;;  %s3260_s13 = sphi %s3296_s13, %s3888_s13   ;;  %s3256_s12 = sphi %s3294_s12, %s3887_s12  }
   0x4   : > { %p23_p0 = scmp.ge.s32.totalorder %s22_s17, 2  ;;  %p2404_p1 = scmp.ge.s32.totalorder %s3272_s16, 1 }
   0x5   : > { %p151_p2 = scmp.lt.s32.totalorder %s3272_s16, 5 }
   0x6   : > { %s3892_s17 = smov (%p23_p0, %s22_s17), 0  ;;  %s3894_s18 = smov (!%p23_p0, %s25_s18), %s3268_s15 }
   0x7   : > { %p152_p3 = pnand %p2404_p1, %p151_p2  ;;  %p27_p4 = scmp.ge.s32.totalorder %s3894_s18, 2 }
   0x8   : > { %v2412_v0 = vld [vmem:[%s3884_s1 + $0x4] sm:$0xf] (!%p152_p3)  ;;  %vm283_vm0 = vcmask (!%p152_p3), 1043456   ;;  %v3332_v1 = vld [vmem:[%s3884_s1 + $0x10] sm:$0xf] (!%p152_p3)  ;;  %p180_p5 = scmp.lt.s32.totalorder (!%p152_p3), %s3260_s13, 1 }
   0x9   : > { %s3896_s18 = smov (%p27_p4, %s3894_s18), 0  ;;  %155 = sbr.rel (%p152_p3) target bundleno = 383 (0x17f), region = 32 }
   0xa   : > { %2829 = vmatprep.subr.msk.mxu1 (!%p152_p3), %vm283_vm0, %v2412_v0  ;;  %2933 = vmatprep.subr.msk.mxu0 (!%p152_p3), %vm283_vm0, %v3332_v1  ;;  %v215_v2 = vld [vmem:[%s3884_s1] sm:$0xf] (!%p152_p3)  ;;  %v2551_v3 = vld [vmem:[%s3884_s1 + $0x14] sm:$0xf] (!%p152_p3)  ;;  %s2411_s27 = smul.u32 (!%p152_p3), 192, %s3256_s12  ;;  %vm234_vm1 = vcmask (!%p152_p3), 31744  }
   0xb   : > { %2830 = vmatpush3.msk.msra.mxu1 (!%p152_p3), %vm283_vm0, %v2412_v0  ;;  %2934 = vmatpush3.msk.msra.mxu0 (!%p152_p3), %vm283_vm0, %v3332_v1  ;;  %v2587_v9 = vld [vmem:[%s3884_s1 + $0x18] sm:$0xf] (!%p152_p3)  ;;  %v3374_v10 = vld [vmem:[%s3884_s1 + $0x8] sm:$0xf] (!%p152_p3)  ;;  %v3437_v20 = vld [vmem:[%s3884_s1 + $0x1c] sm:$0xf] (!%p152_p3) }
   0xc   : > { %2855 = vmatprep.subr.msk.mxu1 (!%p152_p3), %vm283_vm0, %v215_v2  ;;  %2959 = vmatprep.subr.msk.mxu0 (!%p152_p3), %vm283_vm0, %v2551_v3  ;;  %v2483_v37 = vld [vmem:[%s3884_s1 + $0xc] sm:$0xf] (!%p152_p3)  ;;  %v2655_v51 = vld [vmem:[%s3884_s1 + $0x20] sm:$0xf] (!%p152_p3)  ;;  %s2406_s23 = sshll.u32 (!%p152_p3), %s3256_s12, 3  ;;  %vm2283_vm2 = vcmask (!%p152_p3), 64512  }
   0xd   : > { %p188_p6 = scmp.lt.s32.totalorder (!%p152_p3), %s2406_s23, 15 }
  0x10   : > { %s3898_s13 = smov (!%p180_p5, %s3260_s13), 1  ;;  %s3900_s23 = smov (!%p188_p6, %s2406_s23), 15 }
  0x11   : > { %s3193_s28 = smul.u32 432, %s3898_s13  ;;  %s2407_s24 = sshll.u32 %s3900_s23, 1 }
  0x12   : > { %s2408_s25 = sshll.u32 %s3898_s13, 5 }
  0x13   : > { %s184_s4 = scalar_lea.vmem %s3883_s0, %s3193_s28  ;;  %s192_s26 = sadd.s32 %s2408_s25, %s2407_s24 }
  0x14   : > { %s3355_s5 = scalar_lea.vmem %s184_s4, %s2411_s27  ;;  %s2409_s29 = sshll.u32 %s192_s26, 3 }
  0x15   : > { %v216_v4 = vld [vmem:[%s3355_s5 + $0x1] sm:$0xff]  ;;  %v2501_v5 = vld [vmem:[%s3355_s5 + $0x19] sm:$0xff]  ;;  %v217_v6 = vld [vmem:[%s3355_s5 + $0x9] sm:$0xff]  ;;  %s3819_s4 = scalar_lea.vmem %s3886_s3, %s2409_s29 }
  0x16   : > { %2831 = vmatprep.mubr.msk.f32.mxu1 %vm234_vm1, %v216_v4  ;;  %2935 = vmatprep.mubr.msk.f32.mxu0 %vm234_vm1, %v2501_v5  ;;  %v2502_v7 = vld [vmem:[%s3355_s5 + $0x21] sm:$0xff]  ;;  %v3364_v8 = vld [vmem:[%s3355_s5 + $0x31] sm:$0xff]  ;;  %v3379_v11 = vld [vmem:[%s3355_s5 + $0x39] sm:$0xff] }
  0x17   : > { %2832 = vmatmul.mubr.msk.f32.vlgmr.msra.gmra.mrb[0].mxu1 %vm234_vm1, %v217_v6  ;;  %2936 = vmatmul.mubr.msk.f32.vlgmr.msra.gmra.mrb[0].mxu0 %vm234_vm1, %v2502_v7  ;;  %v3385_v12 = vld [vmem:[%s3355_s5 + $0x49] sm:$0xff]  ;;  %v3398_v13 = vld [vmem:[%s3355_s5 + $0x51] sm:$0xff]  ;;  %v3401_v14 = vld [vmem:[%s3355_s5 + $0x61] sm:$0xff] }
  0x18   : > { %2856 = vmatpush3.msk.msra.mxu1 %vm283_vm0, %v215_v2  ;;  %2960 = vmatpush3.msk.msra.mxu0 %vm283_vm0, %v2551_v3  ;;  %v3412_v15 = vld [vmem:[%s3355_s5 + $0x69] sm:$0xff]  ;;  %v3415_v16 = vld [vmem:[%s3355_s5 + $0x1a] sm:$0xff]  ;;  %v3432_v19 = vld [vmem:[%s3355_s5 + $0x32] sm:$0xff] }
  0x19   : > { %2834 = vmatprep.mubr.msk.f32.mxu1 %vm234_vm1, %v2501_v5  ;;  %2938 = vmatprep.mubr.msk.f32.mxu0 %vm234_vm1, %v3364_v8  ;;  %v3426_v17 = vld [vmem:[%s3355_s5 + $0x22] sm:$0xff]  ;;  %v3429_v18 = vld [vmem:[%s3355_s5 + $0x79] sm:$0xff]  ;;  %v3455_v23 = vld [vmem:[%s3355_s5 + $0x91] sm:$0xff] }
  0x1a   : > { %2985 = vmatprep.subr.msk.mxu0 %vm283_vm0, %v2587_v9  ;;  %2881 = vmatprep.subr.msk.mxu1 %vm283_vm0, %v3374_v10  ;;  %v3447_v21 = vld [vmem:[%s3355_s5 + $0x81] sm:$0xff]  ;;  %v3458_v24 = vld [vmem:[%s3355_s5 + $0x4a] sm:$0xff]  ;;  %v3471_v25 = vld [vmem:[%s3355_s5 + $0x99] sm:$0xff] }
  0x1b   : > { %2835 = vmatmul.mubr.msk.f32.gmra.mrb[2].mxu1 %vm234_vm1, %v2502_v7  ;;  %2939 = vmatmul.mubr.msk.f32.gmra.mrb[2].mxu0 %vm234_vm1, %v3379_v11  ;;  %v3450_v22 = vld [vmem:[%s3355_s5 + $0x3a] sm:$0xff]  ;;  %v3474_v26 = vld [vmem:[%s3355_s5 + $0x52] sm:$0xff]  ;;  %v3477_v27 = vld [vmem:[%s3355_s5 + $0xa9] sm:$0xff] }
  0x1c   : > { %2837 = vmatprep.mubr.msk.f32.mxu1 %vm234_vm1, %v3364_v8  ;;  %2941 = vmatprep.mubr.msk.f32.mxu0 %vm234_vm1, %v3385_v12  ;;  %v3480_v28 = vld [vmem:[%s3355_s5 + $0x62] sm:$0xff]  ;;  %v3491_v29 = vld [vmem:[%s3355_s5 + $0xb1] sm:$0xff]  ;;  %v3498_v32 = vld [vmem:[%s3355_s5 + $0x7a] sm:$0xff] }
  0x1d   : > { %v3494_v30 = vld [vmem:[%s3355_s5 + $0x6a] sm:$0xff]  ;;  %v199_v31 = vld [vmem:[%s3355_s5] sm:$0xff]  ;;  %v3512_v35 = vld [vmem:[%s3355_s5 + $0x18] sm:$0xff] }
  0x1e   : > { %v200_v33 = vld [vmem:[%s3355_s5 + $0x8] sm:$0xff]  ;;  %v3515_v36 = vld [vmem:[%s3355_s5 + $0x92] sm:$0xff]  ;;  %v3528_v38 = vld [vmem:[%s3355_s5 + $0x20] sm:$0xff] }
  0x1f   : > { %2838 = vmatmul.mubr.msk.f32.gmra.mrb[4].mxu1 %vm234_vm1, %v3379_v11  ;;  %2942 = vmatmul.mubr.msk.f32.gmra.mrb[4].mxu0 %vm234_vm1, %v3398_v13  ;;  %v3509_v34 = vld [vmem:[%s3355_s5 + $0x82] sm:$0xff]  ;;  %v3531_v39 = vld [vmem:[%s3355_s5 + $0x9a] sm:$0xff]  ;;  %v3536_v40 = vld [vmem:[%s3355_s5 + $0x30] sm:$0xff] }
  0x20   : > { %2840 = vmatprep.mubr.msk.f32.mxu1 %vm234_vm1, %v3385_v12  ;;  %2944 = vmatprep.mubr.msk.f32.mxu0 %vm234_vm1, %v3401_v14  ;;  %v3539_v41 = vld [vmem:[%s3355_s5 + $0xaa] sm:$0xff]  ;;  %v3551_v42 = vld [vmem:[%s3355_s5 + $0x38] sm:$0xff]  ;;  %v3560_v45 = vld [vmem:[%s3355_s5 + $0xc2] sm:$0xff] }
  0x21   : > { %v3554_v43 = vld [vmem:[%s3355_s5 + $0xb2] sm:$0xff]  ;;  %v3557_v44 = vld [vmem:[%s3355_s5 + $0x48] sm:$0xff]  ;;  %v3577_v48 = vld [vmem:[%s3355_s5 + $0x60] sm:$0xff] }
  0x22   : > { %v3571_v46 = vld [vmem:[%s3355_s5 + $0x50] sm:$0xff]  ;;  %v3588_v49 = vld [vmem:[%s3355_s5 + $0x68] sm:$0xff]  ;;  %v3591_v50 = vld [vmem:[%s3355_s5 + $0x78] sm:$0xff] }
  0x23   : > { %2841 = vmatmul.mubr.msk.f32.gmra.mrb[6].mxu1 %vm234_vm1, %v3398_v13  ;;  %2945 = vmatmul.mubr.msk.f32.gmra.mrb[6].mxu0 %vm234_vm1, %v3412_v15  ;;  %v3574_v47 = vld [vmem:[%s3355_s5 + $0xca] sm:$0xff]  ;;  %v3605_v52 = vld [vmem:[%s3355_s5 + $0x80] sm:$0xff]  ;;  %v3622_v54 = vld [vmem:[%s3355_s5 + $0x98] sm:$0xff] }
  0x24   : > { %2843 = vmatprep.mubr.msk.f32.mxu1 %vm234_vm1, %v3401_v14  ;;  %2961 = vmatprep.mubr.msk.f32.mxu0 %vm234_vm1, %v3415_v16  ;;  %v3610_v53 = vld [vmem:[%s3355_s5 + $0x90] sm:$0xff]  ;;  %v3625_v55 = vld [vmem:[%s3355_s5 + $0xa8] sm:$0xff]  ;;  %v3656_v59 = vld [vmem:[%s3355_s5 + $0xc0] sm:$0xff] }
  0x25   : > { %v3636_v56 = vld [vmem:[%s3355_s5 + $0xb0] sm:$0xff]  ;;  %v628_v57 = vld [vmem:[%s3355_s5 + $0x2] sm:$0xff]  ;;  %v2585_v61 = vld [vmem:[%s3355_s5 + $0xd8] sm:$0xff] }
  0x26   : > { %v629_v58 = vld [vmem:[%s3355_s5 + $0xa] sm:$0xff]  ;;  %v2586_v62 = vld [vmem:[%s3355_s5 + $0xe0] sm:$0xff] }
  0x27   : > { %2844 = vmatmul.mubr.msk.f32.gmra.mrb[8].mxu1 %vm234_vm1, %v3412_v15  ;;  %2962 = vmatmul.mubr.msk.f32.vlgmr.msra.gmra.mrb[0].mxu0 %vm234_vm1, %v3426_v17  ;;  %v2584_v60 = vld [vmem:[%s3355_s5 + $0xc8] sm:$0xff]  ;;  %v2653_v3 = vld [vmem:[%s3355_s5 + $0xda] sm:$0xff] }
  0x28   : > { %2986 = vmatpush3.msk.msra.mxu0 %vm283_vm0, %v2587_v9  ;;  %2846 = vmatprep.mubr.msk.f32.mxu1 %vm234_vm1, %v3429_v18  ;;  %v2617_v63 = vld [vmem:[%s3355_s5 + $0xc1] sm:$0xff]  ;;  %v2618_v0 = vld [vmem:[%s3355_s5 + $0xc9] sm:$0xff] }
  0x29   : > { %2964 = vmatprep.mubr.msk.f32.mxu0 %vm234_vm1, %v3432_v19  ;;  %3011 = vmatprep.subr.msk.mxu0 %vm283_vm0, %v3437_v20  ;;  %v2620_v2 = vld [vmem:[%s3355_s5 + $0xe1] sm:$0xff] }
  0x2a   : > { %v2654_v4 = vld [vmem:[%s3355_s5 + $0xe2] sm:$0xff] }
  0x2b   : > { %2847 = vmatmul.mubr.msk.f32.gmra.mrb[10].mxu1 %vm234_vm1, %v3447_v21  ;;  %2965 = vmatmul.mubr.msk.f32.gmra.mrb[2].mxu0 %vm234_vm1, %v3450_v22 }
  0x2c   : > { %2849 = vmatprep.mubr.msk.f32.mxu1 %vm234_vm1, %v3455_v23  ;;  %2967 = vmatprep.mubr.msk.f32.mxu0 %vm234_vm1, %v3458_v24 }
  0x2f   : > { %2850 = vmatmul.mubr.msk.f32.gmra.mrb[12].mxu1 %vm234_vm1, %v3471_v25  ;;  %2968 = vmatmul.mubr.msk.f32.gmra.mrb[4].mxu0 %vm234_vm1, %v3474_v26 }
  0x30   : > { %2852 = vmatprep.mubr.msk.f32.mxu1 %vm234_vm1, %v3477_v27  ;;  %2970 = vmatprep.mubr.msk.f32.mxu0 %vm234_vm1, %v3480_v28 }
  0x33   : > { %2853 = vmatmul.mubr.msk.f32.gmra.mrb[14].mxu1 %vm234_vm1, %v3491_v29  ;;  %2971 = vmatmul.mubr.msk.f32.gmra.mrb[6].mxu0 %vm234_vm1, %v3494_v30 }
  0x34   : > { %2857 = vmatprep.mubr.msk.f32.mxu1 %vm234_vm1, %v199_v31  ;;  %2973 = vmatprep.mubr.msk.f32.mxu0 %vm234_vm1, %v3498_v32 }
  0x37   : > { %2858 = vmatmul.mubr.msk.f32.vlgmr.msra.gmra.mrb[0].mxu1 %vm234_vm1, %v200_v33  ;;  %2974 = vmatmul.mubr.msk.f32.gmra.mrb[8].mxu0 %vm234_vm1, %v3509_v34 }
  0x38   : > { %2882 = vmatpush3.msk.msra.mxu1 %vm283_vm0, %v3374_v10  ;;  %2860 = vmatprep.mubr.msk.f32.mxu1 %vm234_vm1, %v3512_v35 }
  0x39   : > { %2976 = vmatprep.mubr.msk.f32.mxu0 %vm234_vm1, %v3515_v36  ;;  %2907 = vmatprep.subr.msk.mxu1 %vm283_vm0, %v2483_v37 }
  0x3b   : > { %2861 = vmatmul.mubr.msk.f32.gmra.mrb[2].mxu1 %vm234_vm1, %v3528_v38  ;;  %2977 = vmatmul.mubr.msk.f32.gmra.mrb[10].mxu0 %vm234_vm1, %v3531_v39 }
  0x3c   : > { %2863 = vmatprep.mubr.msk.f32.mxu1 %vm234_vm1, %v3536_v40  ;;  %2979 = vmatprep.mubr.msk.f32.mxu0 %vm234_vm1, %v3539_v41 }
  0x3f   : > { %2864 = vmatmul.mubr.msk.f32.gmra.mrb[4].mxu1 %vm234_vm1, %v3551_v42  ;;  %2980 = vmatmul.mubr.msk.f32.gmra.mrb[12].mxu0 %vm234_vm1, %v3554_v43 }
  0x40   : > { %2866 = vmatprep.mubr.msk.f32.mxu1 %vm234_vm1, %v3557_v44  ;;  %2982 = vmatprep.mubr.msk.f32.mxu0 %vm234_vm1, %v3560_v45 }
  0x43   : > { %2867 = vmatmul.mubr.msk.f32.gmra.mrb[6].mxu1 %vm234_vm1, %v3571_v46  ;;  %2983 = vmatmul.mubr.msk.f32.gmra.mrb[14].mxu0 %vm234_vm1, %v3574_v47 }
  0x44   : > { %2869 = vmatprep.mubr.msk.f32.mxu1 %vm234_vm1, %v3577_v48  ;;  %2987 = vmatprep.mubr.msk.f32.mxu0 %vm234_vm1, %v3536_v40 }
  0x47   : > { %2870 = vmatmul.mubr.msk.f32.gmra.mrb[8].mxu1 %vm234_vm1, %v3588_v49  ;;  %2988 = vmatmul.mubr.msk.f32.vlgmr.msra.gmra.mrb[0].mxu0 %vm234_vm1, %v3551_v42 }
  0x48   : > { %3012 = vmatpush3.msk.msra.mxu0 %vm283_vm0, %v3437_v20  ;;  %2872 = vmatprep.mubr.msk.f32.mxu1 %vm234_vm1, %v3591_v50 }
  0x49   : > { %2990 = vmatprep.mubr.msk.f32.mxu0 %vm234_vm1, %v3557_v44  ;;  %3037 = vmatprep.subr.msk.mxu0 %vm283_vm0, %v2655_v51 }
  0x4b   : > { %2873 = vmatmul.mubr.msk.f32.gmra.mrb[10].mxu1 %vm234_vm1, %v3605_v52  ;;  %2991 = vmatmul.mubr.msk.f32.gmra.mrb[2].mxu0 %vm234_vm1, %v3571_v46 }
  0x4c   : > { %2875 = vmatprep.mubr.msk.f32.mxu1 %vm234_vm1, %v3610_v53  ;;  %2993 = vmatprep.mubr.msk.f32.mxu0 %vm234_vm1, %v3577_v48 }
  0x4f   : > { %2876 = vmatmul.mubr.msk.f32.gmra.mrb[12].mxu1 %vm234_vm1, %v3622_v54  ;;  %2994 = vmatmul.mubr.msk.f32.gmra.mrb[4].mxu0 %vm234_vm1, %v3588_v49 }
  0x50   : > { %2878 = vmatprep.mubr.msk.f32.mxu1 %vm234_vm1, %v3625_v55  ;;  %2996 = vmatprep.mubr.msk.f32.mxu0 %vm234_vm1, %v3591_v50 }
  0x53   : > { %2879 = vmatmul.mubr.msk.f32.gmra.mrb[14].mxu1 %vm234_vm1, %v3636_v56  ;;  %2997 = vmatmul.mubr.msk.f32.gmra.mrb[6].mxu0 %vm234_vm1, %v3605_v52 }
  0x54   : > { %2883 = vmatprep.mubr.msk.f32.mxu1 %vm234_vm1, %v628_v57  ;;  %2999 = vmatprep.mubr.msk.f32.mxu0 %vm234_vm1, %v3610_v53 }
  0x57   : > { %2884 = vmatmul.mubr.msk.f32.vlgmr.msra.gmra.mrb[0].mxu1 %vm234_vm1, %v629_v58  ;;  %3000 = vmatmul.mubr.msk.f32.gmra.mrb[8].mxu0 %vm234_vm1, %v3622_v54 }
  0x58   : > { %2908 = vmatpush3.msk.msra.mxu1 %vm283_vm0, %v2483_v37  ;;  %2886 = vmatprep.mubr.msk.f32.mxu1 %vm234_vm1, %v3415_v16 }
  0x59   : > { %3002 = vmatprep.mubr.msk.f32.mxu0 %vm234_vm1, %v3625_v55  ;;  %3063 = vmatprep.subr.msk.mxu1 %vm283_vm0, %v3332_v1 }
  0x5b   : > { %2887 = vmatmul.mubr.msk.f32.gmra.mrb[2].mxu1 %vm234_vm1, %v3426_v17  ;;  %3003 = vmatmul.mubr.msk.f32.gmra.mrb[10].mxu0 %vm234_vm1, %v3636_v56 }
  0x5c   : > { %2889 = vmatprep.mubr.msk.f32.mxu1 %vm234_vm1, %v3432_v19  ;;  %3005 = vmatprep.mubr.msk.f32.mxu0 %vm234_vm1, %v3656_v59 }
  0x5f   : > { %2890 = vmatmul.mubr.msk.f32.gmra.mrb[4].mxu1 %vm234_vm1, %v3450_v22  ;;  %3006 = vmatmul.mubr.msk.f32.gmra.mrb[12].mxu0 %vm234_vm1, %v2584_v60 }
  0x60   : > { %2892 = vmatprep.mubr.msk.f32.mxu1 %vm234_vm1, %v3458_v24  ;;  %3008 = vmatprep.mubr.msk.f32.mxu0 %vm234_vm1, %v2585_v61 }
  0x63   : > { %2893 = vmatmul.mubr.msk.f32.gmra.mrb[6].mxu1 %vm234_vm1, %v3474_v26  ;;  %3009 = vmatmul.mubr.msk.f32.gmra.mrb[14].mxu0 %vm234_vm1, %v2586_v62 }
  0x64   : > { %2895 = vmatprep.mubr.msk.f32.mxu1 %vm234_vm1, %v3480_v28  ;;  %3013 = vmatprep.mubr.msk.f32.mxu0 %vm234_vm1, %v3364_v8 }
  0x67   : > { %2896 = vmatmul.mubr.msk.f32.gmra.mrb[8].mxu1 %vm234_vm1, %v3494_v30  ;;  %3014 = vmatmul.mubr.msk.f32.vlgmr.msra.gmra.mrb[0].mxu0 %vm234_vm1, %v3379_v11 }
  0x68   : > { %3038 = vmatpush3.msk.msra.mxu0 %vm283_vm0, %v2655_v51  ;;  %2898 = vmatprep.mubr.msk.f32.mxu1 %vm234_vm1, %v3498_v32 }
  0x69   : > { %3016 = vmatprep.mubr.msk.f32.mxu0 %vm234_vm1, %v3385_v12 }
  0x6b   : > { %2899 = vmatmul.mubr.msk.f32.gmra.mrb[10].mxu1 %vm234_vm1, %v3509_v34  ;;  %3017 = vmatmul.mubr.msk.f32.gmra.mrb[2].mxu0 %vm234_vm1, %v3398_v13 }
  0x6c   : > { %2901 = vmatprep.mubr.msk.f32.mxu1 %vm234_vm1, %v3515_v36  ;;  %3019 = vmatprep.mubr.msk.f32.mxu0 %vm234_vm1, %v3401_v14  ;;  %v3813_v14 = vld [vmem:[%s3885_s2] ss:$0 sm:$0xff] }
  0x6f   : > { %2902 = vmatmul.mubr.msk.f32.gmra.mrb[12].mxu1 %vm234_vm1, %v3531_v39  ;;  %3020 = vmatmul.mubr.msk.f32.gmra.mrb[4].mxu0 %vm234_vm1, %v3412_v15 }
  0x70   : > { %2904 = vmatprep.mubr.msk.f32.mxu1 %vm234_vm1, %v3539_v41  ;;  %3022 = vmatprep.mubr.msk.f32.mxu0 %vm234_vm1, %v3429_v18 }
  0x73   : > { %2905 = vmatmul.mubr.msk.f32.gmra.mrb[14].mxu1 %vm234_vm1, %v3554_v43  ;;  %3023 = vmatmul.mubr.msk.f32.gmra.mrb[6].mxu0 %vm234_vm1, %v3447_v21 }
  0x74   : > { %2909 = vmatprep.mubr.msk.f32.mxu1 %vm234_vm1, %v3512_v35  ;;  %3025 = vmatprep.mubr.msk.f32.mxu0 %vm234_vm1, %v3455_v23 }
  0x77   : > { %2910 = vmatmul.mubr.msk.f32.vlgmr.msra.gmra.mrb[0].mxu1 %vm234_vm1, %v3528_v38  ;;  %3026 = vmatmul.mubr.msk.f32.gmra.mrb[8].mxu0 %vm234_vm1, %v3471_v25 }
  0x78   : > { %3064 = vmatpush3.msk.msra.mxu1 %vm283_vm0, %v3332_v1  ;;  %2912 = vmatprep.mubr.msk.f32.mxu1 %vm234_vm1, %v3536_v40  ;;  %v2619_v1 = vld [vmem:[%s3355_s5 + $0xd9] sm:$0xff] }
  0x79   : > { %3028 = vmatprep.mubr.msk.f32.mxu0 %vm234_vm1, %v3477_v27 }
  0x7b   : > { %2913 = vmatmul.mubr.msk.f32.gmra.mrb[2].mxu1 %vm234_vm1, %v3551_v42  ;;  %3029 = vmatmul.mubr.msk.f32.gmra.mrb[10].mxu0 %vm234_vm1, %v3491_v29 }
  0x7c   : > { %2915 = vmatprep.mubr.msk.f32.mxu1 %vm234_vm1, %v3557_v44  ;;  %3031 = vmatprep.mubr.msk.f32.mxu0 %vm234_vm1, %v2617_v63 }
  0x7f   : > { %2916 = vmatmul.mubr.msk.f32.gmra.mrb[4].mxu1 %vm234_vm1, %v3571_v46  ;;  %3032 = vmatmul.mubr.msk.f32.gmra.mrb[12].mxu0 %vm234_vm1, %v2618_v0 }
  0x80   : > { %2918 = vmatprep.mubr.msk.f32.mxu1 %vm234_vm1, %v3577_v48  ;;  %3034 = vmatprep.mubr.msk.f32.mxu0 %vm234_vm1, %v2619_v1 }
  0x83   : > { %2919 = vmatmul.mubr.msk.f32.gmra.mrb[6].mxu1 %vm234_vm1, %v3588_v49  ;;  %3035 = vmatmul.mubr.msk.f32.gmra.mrb[14].mxu0 %vm234_vm1, %v2620_v2 }
  0x84   : > { %2921 = vmatprep.mubr.msk.f32.mxu1 %vm234_vm1, %v3591_v50  ;;  %3039 = vmatprep.mubr.msk.f32.mxu0 %vm234_vm1, %v3432_v19 }
  0x87   : > { %2922 = vmatmul.mubr.msk.f32.gmra.mrb[8].mxu1 %vm234_vm1, %v3605_v52  ;;  %3040 = vmatmul.mubr.msk.f32.vlgmr.msra.gmra.mrb[0].mxu0 %vm234_vm1, %v3450_v22 }
  0x88   : > { %2924 = vmatprep.mubr.msk.f32.mxu1 %vm234_vm1, %v3610_v53  ;;  %3042 = vmatprep.mubr.msk.f32.mxu0 %vm234_vm1, %v3458_v24 }
  0x8b   : > { %2925 = vmatmul.mubr.msk.f32.gmra.mrb[10].mxu1 %vm234_vm1, %v3622_v54  ;;  %3043 = vmatmul.mubr.msk.f32.gmra.mrb[2].mxu0 %vm234_vm1, %v3474_v26 }
  0x8c   : > { %2927 = vmatprep.mubr.msk.f32.mxu1 %vm234_vm1, %v3625_v55  ;;  %3045 = vmatprep.mubr.msk.f32.mxu0 %vm234_vm1, %v3480_v28 }
  0x8f   : > { %2928 = vmatmul.mubr.msk.f32.gmra.mrb[12].mxu1 %vm234_vm1, %v3636_v56  ;;  %3046 = vmatmul.mubr.msk.f32.gmra.mrb[4].mxu0 %vm234_vm1, %v3494_v30 }
  0x90   : > { %2930 = vmatprep.mubr.msk.f32.mxu1 %vm234_vm1, %v3656_v59  ;;  %3048 = vmatprep.mubr.msk.f32.mxu0 %vm234_vm1, %v3498_v32 }
  0x93   : > { %2931 = vmatmul.mubr.msk.f32.gmra.mrb[14].mxu1 %vm234_vm1, %v2584_v60  ;;  %3049 = vmatmul.mubr.msk.f32.gmra.mrb[6].mxu0 %vm234_vm1, %v3509_v34 }
  0x94   : > { %2947 = vmatprep.mubr.msk.f32.mxu1 %vm234_vm1, %v3429_v18  ;;  %3051 = vmatprep.mubr.msk.f32.mxu0 %vm234_vm1, %v3515_v36 }
  0x97   : > { %2948 = vmatmul.mubr.msk.f32.vlgmr.msra.gmra.mrb[8].mxu1 %vm234_vm1, %v3447_v21  ;;  %3052 = vmatmul.mubr.msk.f32.gmra.mrb[8].mxu0 %vm234_vm1, %v3531_v39 }
  0x98   : > { %2950 = vmatprep.mubr.msk.f32.mxu1 %vm234_vm1, %v3455_v23  ;;  %3054 = vmatprep.mubr.msk.f32.mxu0 %vm234_vm1, %v3539_v41 }
  0x9b   : > { %2951 = vmatmul.mubr.msk.f32.gmra.mrb[10].mxu1 %vm234_vm1, %v3471_v25  ;;  %3055 = vmatmul.mubr.msk.f32.gmra.mrb[10].mxu0 %vm234_vm1, %v3554_v43 }
  0x9c   : > { %2953 = vmatprep.mubr.msk.f32.mxu1 %vm234_vm1, %v3477_v27  ;;  %3057 = vmatprep.mubr.msk.f32.mxu0 %vm234_vm1, %v3560_v45 }
  0x9f   : > { %2954 = vmatmul.mubr.msk.f32.gmra.mrb[12].mxu1 %vm234_vm1, %v3491_v29  ;;  %3058 = vmatmul.mubr.msk.f32.gmra.mrb[12].mxu0 %vm234_vm1, %v3574_v47 }
  0xa0   : > { %2956 = vmatprep.mubr.msk.f32.mxu1 %vm234_vm1, %v2617_v63  ;;  %3060 = vmatprep.mubr.msk.f32.mxu0 %vm234_vm1, %v2653_v3 }
  0xa3   : > { %2957 = vmatmul.mubr.msk.f32.gmra.mrb[14].mxu1 %vm234_vm1, %v2618_v0  ;;  %3061 = vmatmul.mubr.msk.f32.gmra.mrb[14].mxu0 %vm234_vm1, %v2654_v4 }
 0x14a   : > { %v2911_v5 = vpop.f32.mrb[0].mxu1 }
 0x14b   : > { %v996_v6 = vpop.f32.mrb[1].mxu1 }
 0x14e   : > { %v2914_v7 = vpop.f32.mrb[2].mxu1 }
 0x14f   : > { %v1006_v8 = vpop.f32.mrb[3].mxu1 }
 0x152   : > { %v2917_v9 = vpop.f32.mrb[4].mxu1 }
 0x153   : > { %v1016_v10 = vpop.f32.mrb[5].mxu1 }
 0x156   : > { %v2920_v11 = vpop.f32.mrb[6].mxu1 }
 0x157   : > { %v1026_v12 = vpop.f32.mrb[7].mxu1 }
 0x15a   : > { %v3041_v13 = vpop.f32.mrb[0].mxu0 }
 0x15b   : > { %v3065_v15 = vadd.f32 %v3041_v13, %v2911_v5  ;;  %v2149_v16 = vpop.f32.mrb[1].mxu0 }
 0x15c   : > { %v3066_v17 = vadd.f32 %v2149_v16, %v996_v6 }
 0x15d   : > { %v2252_v18 = vadd.f32 %v3065_v15, %v3813_v14 }
 0x15e   : > { %v2251_v19 = vadd.f32 %v3066_v17, %v3813_v14  ;;  %v3044_v20 = vpop.f32.mrb[2].mxu0 }
 0x15f   : > { %v2268_v21 = vmax.f32 %v2252_v18, 0.0  ;;  %v3067_v22 = vadd.f32 %v3044_v20, %v2914_v7  ;;  %v2159_v23 = vpop.f32.mrb[3].mxu0 }
 0x160   : > { %v2267_v24 = vmax.f32 %v2251_v19, 0.0  ;;  %v3068_v25 = vadd.f32 %v2159_v23, %v1006_v8 }
 0x161   : > { %2285 = vst.msk [vmem:[%s3819_s4 + $0x8] sm:$0xff] %vm2283_vm2, %v2268_v21  ;;  %v2254_v26 = vadd.f32 %v3067_v22, %v3813_v14 }
 0x162   : > { %2284 = vst.msk [vmem:[%s3819_s4] sm:$0xff] %vm2283_vm2, %v2267_v24  ;;  %v2253_v27 = vadd.f32 %v3068_v25, %v3813_v14  ;;  %v3047_v28 = vpop.f32.mrb[4].mxu0 }
 0x163   : > { %v2270_v29 = vmax.f32 %v2254_v26, 0.0  ;;  %v3069_v30 = vadd.f32 %v3047_v28, %v2917_v9  ;;  %v2169_v31 = vpop.f32.mrb[5].mxu0 }
 0x164   : > { %v2269_v32 = vmax.f32 %v2253_v27, 0.0  ;;  %v3070_v33 = vadd.f32 %v2169_v31, %v1016_v10 }
 0x165   : > { %2287 = vst.msk [vmem:[%s3819_s4 + $0x18] sm:$0xff] %vm2283_vm2, %v2270_v29  ;;  %v2256_v34 = vadd.f32 %v3069_v30, %v3813_v14 }
 0x166   : > { %2286 = vst.msk [vmem:[%s3819_s4 + $0x10] sm:$0xff] %vm2283_vm2, %v2269_v32  ;;  %v2255_v35 = vadd.f32 %v3070_v33, %v3813_v14  ;;  %v3050_v36 = vpop.f32.mrb[6].mxu0 }
 0x167   : > { %v2272_v37 = vmax.f32 %v2256_v34, 0.0  ;;  %v3071_v38 = vadd.f32 %v3050_v36, %v2920_v11  ;;  %v2179_v39 = vpop.f32.mrb[7].mxu0 }
 0x168   : > { %v2271_v40 = vmax.f32 %v2255_v35, 0.0  ;;  %v3072_v41 = vadd.f32 %v2179_v39, %v1026_v12 }
 0x169   : > { %2289 = vst.msk [vmem:[%s3819_s4 + $0x28] sm:$0xff] %vm2283_vm2, %v2272_v37  ;;  %v2258_v42 = vadd.f32 %v3071_v38, %v3813_v14 }
 0x16a   : > { %2288 = vst.msk [vmem:[%s3819_s4 + $0x20] sm:$0xff] %vm2283_vm2, %v2271_v40  ;;  %v2257_v43 = vadd.f32 %v3072_v41, %v3813_v14  ;;  %v2949_v44 = vpop.f32.mrb[8].mxu1  ;;  %v3053_v45 = vpop.f32.mrb[8].mxu0 }
 0x16b   : > { %v2274_v46 = vmax.f32 %v2258_v42, 0.0  ;;  %v3073_v47 = vadd.f32 %v3053_v45, %v2949_v44  ;;  %v1266_v48 = vpop.f32.mrb[9].mxu1  ;;  %v2189_v49 = vpop.f32.mrb[9].mxu0 }
 0x16c   : > { %v2273_v50 = vmax.f32 %v2257_v43, 0.0  ;;  %v3074_v51 = vadd.f32 %v2189_v49, %v1266_v48 }
 0x16d   : > { %2291 = vst.msk [vmem:[%s3819_s4 + $0x38] sm:$0xff] %vm2283_vm2, %v2274_v46  ;;  %v2260_v52 = vadd.f32 %v3073_v47, %v3813_v14 }
 0x16e   : > { %2290 = vst.msk [vmem:[%s3819_s4 + $0x30] sm:$0xff] %vm2283_vm2, %v2273_v50  ;;  %v2259_v53 = vadd.f32 %v3074_v51, %v3813_v14  ;;  %v2952_v54 = vpop.f32.mrb[10].mxu1  ;;  %v3056_v55 = vpop.f32.mrb[10].mxu0 }
 0x16f   : > { %v2276_v56 = vmax.f32 %v2260_v52, 0.0  ;;  %v3075_v57 = vadd.f32 %v3056_v55, %v2952_v54  ;;  %v1276_v58 = vpop.f32.mrb[11].mxu1  ;;  %v2199_v59 = vpop.f32.mrb[11].mxu0 }
 0x170   : > { %v2275_v60 = vmax.f32 %v2259_v53, 0.0  ;;  %v3076_v61 = vadd.f32 %v2199_v59, %v1276_v58 }
 0x171   : > { %2293 = vst.msk [vmem:[%s3819_s4 + $0x48] sm:$0xff] %vm2283_vm2, %v2276_v56  ;;  %v2262_v62 = vadd.f32 %v3075_v57, %v3813_v14 }
 0x172   : > { %2292 = vst.msk [vmem:[%s3819_s4 + $0x40] sm:$0xff] %vm2283_vm2, %v2275_v60  ;;  %v2261_v63 = vadd.f32 %v3076_v61, %v3813_v14  ;;  %v2955_v0 = vpop.f32.mrb[12].mxu1  ;;  %v3059_v1 = vpop.f32.mrb[12].mxu0 }
 0x173   : > { %v2278_v2 = vmax.f32 %v2262_v62, 0.0  ;;  %v3077_v3 = vadd.f32 %v3059_v1, %v2955_v0  ;;  %v1286_v4 = vpop.f32.mrb[13].mxu1  ;;  %v2209_v5 = vpop.f32.mrb[13].mxu0 }
 0x174   : > { %v2277_v6 = vmax.f32 %v2261_v63, 0.0  ;;  %v3078_v7 = vadd.f32 %v2209_v5, %v1286_v4 }
 0x175   : > { %2295 = vst.msk [vmem:[%s3819_s4 + $0x58] sm:$0xff] %vm2283_vm2, %v2278_v2  ;;  %v2264_v8 = vadd.f32 %v3077_v3, %v3813_v14 }
 0x176   : > { %2294 = vst.msk [vmem:[%s3819_s4 + $0x50] sm:$0xff] %vm2283_vm2, %v2277_v6  ;;  %v2263_v9 = vadd.f32 %v3078_v7, %v3813_v14  ;;  %v2958_v10 = vpop.f32.mrb[14].mxu1  ;;  %v3062_v11 = vpop.f32.mrb[14].mxu0 }
 0x177   : > { %v2280_v12 = vmax.f32 %v2264_v8, 0.0  ;;  %v3079_v13 = vadd.f32 %v3062_v11, %v2958_v10  ;;  %v1296_v15 = vpop.f32.mrb[15].mxu1  ;;  %v2219_v16 = vpop.f32.mrb[15].mxu0 }
 0x178   : > { %v2279_v17 = vmax.f32 %v2263_v9, 0.0  ;;  %v3080_v18 = vadd.f32 %v2219_v16, %v1296_v15 }
 0x179   : > { %2297 = vst.msk [vmem:[%s3819_s4 + $0x68] sm:$0xff] %vm2283_vm2, %v2280_v12  ;;  %v2266_v19 = vadd.f32 %v3079_v13, %v3813_v14 }
 0x17a   : > { %2296 = vst.msk [vmem:[%s3819_s4 + $0x60] sm:$0xff] %vm2283_vm2, %v2279_v17  ;;  %v2265_v20 = vadd.f32 %v3080_v18, %v3813_v14 }
 0x17b   : > { %v2282_v21 = vmax.f32 %v2266_v19, 0.0 }
 0x17c   : > { %v2281_v22 = vmax.f32 %v2265_v20, 0.0 }
 0x17d   : > { %2299 = vst.msk [vmem:[%s3819_s4 + $0x78] sm:$0xff] %vm2283_vm2, %v2282_v21 }
 0x17e   : > { %2298 = vst.msk [vmem:[%s3819_s4 + $0x70] sm:$0xff] %vm2283_vm2, %v2281_v22 }
 0x17f PF: > { %s13_s16 = sadd.s32 1, %s3272_s16   ;;  %s3887_s12 = smov %s3264_s14 }
 0x180   : > { %p10_p7 = scmp.ge.s32.totalorder %s13_s16, 6   ;;  %s3888_s13 = smov %s3268_s15 }
 0x181   : > { %s3889_s14 = smov %s3892_s17  ;;  %s3890_s15 = smov %s3896_s18 }
 0x182   :  { %12 = sbr.rel (!%p10_p7) target bundleno = 3 (0x3), region = 73 }

</bundles_post_ra>
